<compile_context>
chip_gen: v6e
topology: v6e:2x2x1
jax: 0.10.0
libtpu: 0.0.40
codegen_flags: <defaults>
</compile_context>

<pallas_src>
import functools

import jax
import jax.numpy as jnp
import numpy as np
from jax.experimental import pallas as pl
from jax.experimental.pallas import tpu as pltpu

MAX_LENGTH = 10
HIDDEN = 32       # hidden_size (small synthetic size)
OUTPUT = 64       # output_size (vocab)
N_LAYERS = 2      # n_layers (kernel hard-codes 2 GRU layers)
SEQ = 8           # encoder sequence length
DROPOUT_P = 0.05  # eval mode -> identity
LANE = 128        # TPU lane width
NEG = -1e30       # "minus infinity" for padded softmax lanes (finite -> no NaN)

# ---- packed-slab row layout (8-row aligned matrices, H = 32) ---------------
R_WAT = 0                       # Wa^T              (H, H)
R_W0X = R_WAT + HIDDEN          # wih0 (x part)     (H, 3H)
R_W0C = R_W0X + HIDDEN          # wih0 (ctx part)   (H, 3H)
R_W0H = R_W0C + HIDDEN          # whh0              (H, 3H)
R_W1X = R_W0H + HIDDEN          # wih1              (H, 3H)
R_W1H = R_W1X + HIDDEN          # whh1              (H, 3H)
R_WOUT = R_W1H + HIDDEN         # wout              (H, V) zero-padded to 128
R_BIAS = R_WOUT + HIDDEN        # bias block starts here
B_BA, B_BIH0, B_BHH0, B_BIH1, B_BHH1, B_BOUT, B_SMASK = (
    R_BIAS + i for i in range(7))
SLAB_ROWS = ((R_BIAS + 7 + 7) // 8) * 8     # 232 rows, multiple of 8


def _gru_update(gi, gh, h_prev, H):
    """PyTorch GRU gate order [r, z, n]; gi/gh are (1, 3H)."""
    r = jax.nn.sigmoid(gi[:, 0:H] + gh[:, 0:H])
    z = jax.nn.sigmoid(gi[:, H:2 * H] + gh[:, H:2 * H])
    n = jnp.tanh(gi[:, 2 * H:3 * H] + r * gh[:, 2 * H:3 * H])
    return (1.0 - z) * n + z * h_prev


def decoder_kernel(word_ids_ref,        # SMEM (T,) int32  (scalar prefetch)
                   emb_ref,             # VMEM (V, H)  full table, resident
                   h_init_ref,          # VMEM (L, H)  initial hidden
                   enc_pad_ref,         # VMEM (128, H) encoder outs, 0-padded rows
                   encT_pad_ref,        # VMEM (H, 128) encoder outs^T, 0-padded cols
                   slab_ref,            # VMEM (SLAB_ROWS, 128) packed weights
                   logp_ref,            # VMEM (T, 128) out, lane-dense
                   hidden_ref,          # VMEM (L, H)   out, final hidden
                   attn_ref,            # VMEM (T, 128) out, lane-dense
                   h_state):            # VMEM scratch (L, H), carried across steps
    H = HIDDEN
    t = pl.program_id(0)

    # seed the carried hidden state on the first step
    @pl.when(t == 0)
    def _():
        h_state[...] = h_init_ref[...]

    # ---- static views into the packed slab (no per-step DMA) --------------
    waT = slab_ref[R_WAT:R_WAT + H, 0:H]
    w0x = slab_ref[R_W0X:R_W0X + H, 0:3 * H]
    w0c = slab_ref[R_W0C:R_W0C + H, 0:3 * H]
    w0h = slab_ref[R_W0H:R_W0H + H, 0:3 * H]
    w1x = slab_ref[R_W1X:R_W1X + H, 0:3 * H]
    w1h = slab_ref[R_W1H:R_W1H + H, 0:3 * H]
    wout = slab_ref[R_WOUT:R_WOUT + H, :]            # (H, 128), 0 beyond V
    ba = slab_ref[B_BA:B_BA + 1, 0:H]
    bih0 = slab_ref[B_BIH0:B_BIH0 + 1, 0:3 * H]
    bhh0 = slab_ref[B_BHH0:B_BHH0 + 1, 0:3 * H]
    bih1 = slab_ref[B_BIH1:B_BIH1 + 1, 0:3 * H]
    bhh1 = slab_ref[B_BHH1:B_BHH1 + 1, 0:3 * H]
    bout = slab_ref[B_BOUT:B_BOUT + 1, :]            # (1, 128), NEG beyond V
    smask = slab_ref[B_SMASK:B_SMASK + 1, :]         # (1, 128), NEG beyond S

    h_prev = h_state[...]                            # (L, H)
    h0_prev = h_prev[0:1, :]
    h1_prev = h_prev[1:2, :]                         # top layer == last_hidden[-1]

    # ---- embedding lookup (dropout == identity at eval) --------------------
    wid = word_ids_ref[t]
    x = emb_ref[pl.ds(wid, 1), :]                    # (1, H)

    # ---- attention (general score), all matmuls on the MXU ----------------
    # e_i = h_top . (Wa enc_i + ba)  ==  (h_top @ Wa^T) . enc_i + (ba . h_top)
    u = jnp.dot(h1_prev, waT, preferred_element_type=jnp.float32)       # (1, H)
    c = jnp.sum(ba * h1_prev, axis=-1, keepdims=True)                   # (1, 1)
    scores = (jnp.dot(u, encT_pad_ref[...],
                      preferred_element_type=jnp.float32) + c + smask)  # (1, 128)
    m = jnp.max(scores, axis=-1, keepdims=True)
    p = jnp.exp(scores - m)                          # padded lanes -> exp(~-1e30)=0
    denom = jnp.sum(p, axis=-1, keepdims=True)
    alpha = p / denom                                # exact divide (keeps 1e-4 parity)
    attn_ref[pl.ds(t, 1), :] = alpha                 # full 128-lane row store

    context = jnp.dot(alpha, enc_pad_ref[...],
                      preferred_element_type=jnp.float32)               # (1, H)

    # ---- 2-layer GRU, one time step (no lane-axis concat) ------------------
    gi0 = (jnp.dot(x, w0x, preferred_element_type=jnp.float32)
           + jnp.dot(context, w0c, preferred_element_type=jnp.float32) + bih0)
    gh0 = jnp.dot(h0_prev, w0h, preferred_element_type=jnp.float32) + bhh0
    h0_new = _gru_update(gi0, gh0, h0_prev, H)

    gi1 = jnp.dot(h0_new, w1x, preferred_element_type=jnp.float32) + bih1
    gh1 = jnp.dot(h1_prev, w1h, preferred_element_type=jnp.float32) + bhh1
    h1_new = _gru_update(gi1, gh1, h1_prev, H)

    h_state[0:1, :] = h0_new
    h_state[1:2, :] = h1_new

    # ---- output projection + log_softmax (padded lanes carry NEG bias) ----
    logits = jnp.dot(h1_new, wout,
                     preferred_element_type=jnp.float32) + bout         # (1, 128)
    lmax = jnp.max(logits, axis=-1, keepdims=True)
    lse = jnp.log(jnp.sum(jnp.exp(logits - lmax), axis=-1, keepdims=True)) + lmax
    logp_ref[pl.ds(t, 1), :] = logits - lse          # full 128-lane row store

    @pl.when(t == pl.num_programs(0) - 1)
    def _():
        hidden_ref[0:1, :] = h0_new
        hidden_ref[1:2, :] = h1_new


def pack_params(params, seq_len):
    """Pack all non-embedding weights into one 128-lane f32 slab."""
    H, V = HIDDEN, OUTPUT
    slab = jnp.zeros((SLAB_ROWS, LANE), jnp.float32)
    slab = slab.at[R_WAT:R_WAT + H, 0:H].set(params["wa"].T)
    slab = slab.at[R_W0X:R_W0X + H, 0:3 * H].set(params["wih0_x"])
    slab = slab.at[R_W0C:R_W0C + H, 0:3 * H].set(params["wih0_c"])
    slab = slab.at[R_W0H:R_W0H + H, 0:3 * H].set(params["whh0"])
    slab = slab.at[R_W1X:R_W1X + H, 0:3 * H].set(params["wih1"])
    slab = slab.at[R_W1H:R_W1H + H, 0:3 * H].set(params["whh1"])
    slab = slab.at[R_WOUT:R_WOUT + H, 0:V].set(params["wout"])
    slab = slab.at[B_BA, 0:H].set(params["ba"][0])
    slab = slab.at[B_BIH0, 0:3 * H].set(params["bih0"][0])
    slab = slab.at[B_BHH0, 0:3 * H].set(params["bhh0"][0])
    slab = slab.at[B_BIH1, 0:3 * H].set(params["bih1"][0])
    slab = slab.at[B_BHH1, 0:3 * H].set(params["bhh1"][0])
    slab = slab.at[B_BOUT, 0:V].set(params["bout"][0])
    slab = slab.at[B_BOUT, V:].set(NEG)              # log_softmax lane padding
    slab = slab.at[B_SMASK, seq_len:].set(NEG)       # attention softmax lane padding
    return slab


@jax.jit
def bahdanau_decoder_steps(word_ids, last_hidden, encoder_outputs, params):
    """Run T teacher-forced decode steps in a single pallas_call.

    word_ids: (T,) int32; last_hidden: (L, 1, H); encoder_outputs: (S, 1, H).
    Returns (log_probs (T, V), final_hidden (L, 1, H), attn (T, 1, 1, S)).
    T == 1 reproduces the original module forward exactly.
    """
    T = word_ids.shape[0]
    L, _, H = last_hidden.shape
    S = encoder_outputs.shape[0]
    V = params["emb"].shape[0]

    h_init = last_hidden[:, 0, :]                    # (L, H)
    enc = encoder_outputs[:, 0, :]                   # (S, H)
    enc_pad = jnp.zeros((LANE, H), jnp.float32).at[:S, :].set(enc)     # (128, H)
    encT_pad = jnp.zeros((H, LANE), jnp.float32).at[:, :S].set(enc.T)  # (H, 128)
    slab = pack_params(params, S)                    # (232, 128)

    grid_spec = pltpu.PrefetchScalarGridSpec(
        num_scalar_prefetch=1,                       # word_ids -> SMEM
        grid=(T,),
        in_specs=[
            pl.BlockSpec((V, H), lambda t, wid: (0, 0)),          # emb (resident)
            pl.BlockSpec((L, H), lambda t, wid: (0, 0)),          # h_init
            pl.BlockSpec((LANE, H), lambda t, wid: (0, 0)),       # enc_pad
            pl.BlockSpec((H, LANE), lambda t, wid: (0, 0)),       # encT_pad
            pl.BlockSpec((SLAB_ROWS, LANE), lambda t, wid: (0, 0)),  # weight slab
        ],
        out_specs=(
            pl.BlockSpec((T, LANE), lambda t, wid: (0, 0)),       # log-probs
            pl.BlockSpec((L, H), lambda t, wid: (0, 0)),          # final hidden
            pl.BlockSpec((T, LANE), lambda t, wid: (0, 0)),       # attention
        ),
        scratch_shapes=[pltpu.VMEM((L, H), jnp.float32)],         # carried hidden
    )

    logp_pad, hidden, attn_pad = pl.pallas_call(
        decoder_kernel,
        grid_spec=grid_spec,
        out_shape=(
            jax.ShapeDtypeStruct((T, LANE), jnp.float32),
            jax.ShapeDtypeStruct((L, H), jnp.float32),
            jax.ShapeDtypeStruct((T, LANE), jnp.float32),
        ),
        compiler_params=pltpu.CompilerParams(
            dimension_semantics=("arbitrary",)),     # steps are sequentially dependent
    )(word_ids.astype(jnp.int32), params["emb"], h_init, enc_pad, encT_pad, slab)

    output = logp_pad[:, :V]                         # (T, V)
    hidden = hidden[:, None, :]                      # (L, 1, H)
    attn_weights = attn_pad[:, :S].reshape(T, 1, 1, S)
    return output, hidden, attn_weights


def bahdanau_decoder_step(word_id, last_hidden, encoder_outputs, params):
    """Original single-step forward: (1,V) log-probs, (L,1,H) hidden, (1,1,S) attn."""
    out, hidden, attn = bahdanau_decoder_steps(
        word_id.reshape(1), last_hidden, encoder_outputs, params)
    return out[0:1], hidden, attn[0]


# ----------------------------- pure-JAX reference ---------------------------
def reference_step(word_id, last_hidden, encoder_outputs, params):
    H = HIDDEN
    h_last = last_hidden[:, 0, :]
    enc = encoder_outputs[:, 0, :]
    x = params["emb"][word_id[0]][None, :]
    h_top = h_last[-1:, :]
    proj = enc @ params["wa"] + params["ba"]
    e = jnp.sum(proj * h_top, axis=-1)
    alpha = jax.nn.softmax(e)
    context = (alpha[:, None] * enc).sum(axis=0, keepdims=True)

    def cell(gi, gh, h_prev):
        r = jax.nn.sigmoid(gi[:, :H] + gh[:, :H])
        z = jax.nn.sigmoid(gi[:, H:2 * H] + gh[:, H:2 * H])
        n = jnp.tanh(gi[:, 2 * H:] + r * gh[:, 2 * H:])
        return (1 - z) * n + z * h_prev

    gi0 = x @ params["wih0_x"] + context @ params["wih0_c"] + params["bih0"]
    gh0 = h_last[0:1] @ params["whh0"] + params["bhh0"]
    h0 = cell(gi0, gh0, h_last[0:1])
    gi1 = h0 @ params["wih1"] + params["bih1"]
    gh1 = h_last[1:2] @ params["whh1"] + params["bhh1"]
    h1 = cell(gi1, gh1, h_last[1:2])
    logits = h1 @ params["wout"] + params["bout"]
    logp = jax.nn.log_softmax(logits, axis=-1)
    hidden = jnp.stack([h0[0], h1[0]], axis=0)[:, None, :]
    return logp, hidden, alpha[None, None, :]


def init_params(key):
    ks = jax.random.split(key, 16)
    f = lambda k, s: jax.random.normal(k, s, dtype=jnp.float32) * 0.1
    H, V = HIDDEN, OUTPUT
    return {
        "emb":    f(ks[0], (V, H)),
        "wa":     f(ks[1], (H, H)),      "ba":   f(ks[2], (1, H)),
        "wih0_x": f(ks[3], (H, 3 * H)),  "wih0_c": f(ks[4], (H, 3 * H)),
        "whh0":   f(ks[5], (H, 3 * H)),
        "bih0":   f(ks[6], (1, 3 * H)),  "bhh0": f(ks[7], (1, 3 * H)),
        "wih1":   f(ks[8], (H, 3 * H)),  "whh1": f(ks[9], (H, 3 * H)),
        "bih1":   f(ks[10], (1, 3 * H)), "bhh1": f(ks[11], (1, 3 * H)),
        "wout":   f(ks[12], (H, V)),     "bout": f(ks[13], (1, V)),
    }


if __name__ == "__main__":
    key = jax.random.PRNGKey(0)
    kp, kh, ke = jax.random.split(key, 3)
    params = init_params(kp)

    word_ids = jnp.array([1, 2, 3], dtype=jnp.int32)        # as in the source file
    last_hidden = jax.random.normal(kh, (N_LAYERS, 1, HIDDEN), jnp.float32)
    encoder_outputs = jax.random.normal(ke, (SEQ, 1, HIDDEN), jnp.float32)

    # --- fused multi-step decode (3 steps in one pallas_call) ---------------
    out, hidden, attn = jax.block_until_ready(
        bahdanau_decoder_steps(word_ids, last_hidden, encoder_outputs, params))

    ref_outs, ref_attns = [], []
    h_ref = last_hidden
    for t in range(word_ids.shape[0]):
        o, h_ref, a = reference_step(word_ids[t:t + 1], h_ref,
                                     encoder_outputs, params)
        ref_outs.append(o)
        ref_attns.append(a)
    ref_out = jnp.concatenate(ref_outs, axis=0)
    ref_attn = jnp.stack(ref_attns, axis=0)

    np.testing.assert_allclose(np.asarray(out), np.asarray(ref_out),
                               rtol=1e-4, atol=1e-4)
    np.testing.assert_allclose(np.asarray(hidden), np.asarray(h_ref),
                               rtol=1e-4, atol=1e-4)
    np.testing.assert_allclose(np.asarray(attn), np.asarray(ref_attn),
                               rtol=1e-4, atol=1e-4)
    assert out.shape == (3, OUTPUT)
    assert hidden.shape == (N_LAYERS, 1, HIDDEN)
    assert attn.shape == (3, 1, 1, SEQ)

    # --- single-step API (original module forward semantics) ----------------
    out1, hid1, attn1 = jax.block_until_ready(
        bahdanau_decoder_step(word_ids[0:1], last_hidden, encoder_outputs, params))
    r_o, r_h, r_a = reference_step(word_ids[0:1], last_hidden,
                                   encoder_outputs, params)
    np.testing.assert_allclose(np.asarray(out1), np.asarray(r_o),
                               rtol=1e-4, atol=1e-4)
    np.testing.assert_allclose(np.asarray(hid1), np.asarray(r_h),
                               rtol=1e-4, atol=1e-4)
    np.testing.assert_allclose(np.asarray(attn1), np.asarray(r_a),
                               rtol=1e-4, atol=1e-4)
    assert out1.shape == (1, OUTPUT)
    assert hid1.shape == (N_LAYERS, 1, HIDDEN)
    assert attn1.shape == (1, 1, SEQ)

    print("KERNEL_OK")
</pallas_src>

<mosaic_0001>
module attributes {stable_mosaic.version = 11 : i64} {
  func.func @decoder_kernel(%arg0: i32, %arg1: memref<3xi32, #tpu.memory_space<smem>>, %arg2: memref<64x32xf32, #tpu.memory_space<vmem>>, %arg3: memref<2x32xf32, #tpu.memory_space<vmem>>, %arg4: memref<128x32xf32, #tpu.memory_space<vmem>>, %arg5: memref<32x128xf32, #tpu.memory_space<vmem>>, %arg6: memref<232x128xf32, #tpu.memory_space<vmem>>, %arg7: memref<3x128xf32, #tpu.memory_space<vmem>>, %arg8: memref<2x32xf32, #tpu.memory_space<vmem>>, %arg9: memref<3x128xf32, #tpu.memory_space<vmem>>, %arg10: memref<2x32xf32, #tpu.memory_space<vmem>>) attributes {dimension_semantics = [#tpu.dimension_semantics<arbitrary>], iteration_bounds = array<i64: 3>, scalar_prefetch = 1 : i64, scratch_operands = 1 : i64, tpu.core_type = #tpu.core_type<tc>, window_params = [{pipeline_mode = #tpu.pipeline_mode<synchronous>, transform_indices = @transform_0, window_bounds = array<i64: 64, 32>}, {pipeline_mode = #tpu.pipeline_mode<synchronous>, transform_indices = @transform_1, window_bounds = array<i64: 2, 32>}, {pipeline_mode = #tpu.pipeline_mode<synchronous>, transform_indices = @transform_2, window_bounds = array<i64: 128, 32>}, {pipeline_mode = #tpu.pipeline_mode<synchronous>, transform_indices = @transform_3, window_bounds = array<i64: 32, 128>}, {pipeline_mode = #tpu.pipeline_mode<synchronous>, transform_indices = @transform_4, window_bounds = array<i64: 232, 128>}, {pipeline_mode = #tpu.pipeline_mode<synchronous>, transform_indices = @transform_5, window_bounds = array<i64: 3, 128>}, {pipeline_mode = #tpu.pipeline_mode<synchronous>, transform_indices = @transform_6, window_bounds = array<i64: 2, 32>}, {pipeline_mode = #tpu.pipeline_mode<synchronous>, transform_indices = @transform_7, window_bounds = array<i64: 3, 128>}]} {
    %c0_i32 = arith.constant 0 : i32
    %0 = arith.cmpi eq, %arg0, %c0_i32 : i32
    %1 = arith.extui %0 : i1 to i32
    %c0_i32_0 = arith.constant 0 : i32
    %2 = arith.cmpi ne, %1, %c0_i32_0 : i32
    scf.if %2 {
      %c0_47 = arith.constant 0 : index
      %c0_48 = arith.constant 0 : index
      %128 = vector.load %arg3[%c0_47, %c0_48] : memref<2x32xf32, #tpu.memory_space<vmem>>, vector<2x32xf32>
      %c0_49 = arith.constant 0 : index
      %c0_50 = arith.constant 0 : index
      %129 = vector.load %arg10[%c0_49, %c0_50] : memref<2x32xf32, #tpu.memory_space<vmem>>, vector<2x32xf32>
      tpu.vector_store %arg10[%c0_49, %c0_50], %128 {strides = array<i32>} : memref<2x32xf32, #tpu.memory_space<vmem>>, vector<2x32xf32>,
    } else {
    }
    %c0 = arith.constant 0 : index
    %c0_1 = arith.constant 0 : index
    %3 = vector.load %arg6[%c0, %c0_1] : memref<232x128xf32, #tpu.memory_space<vmem>>, vector<32x32xf32>
    %c32 = arith.constant 32 : index
    %c0_2 = arith.constant 0 : index
    %4 = vector.load %arg6[%c32, %c0_2] : memref<232x128xf32, #tpu.memory_space<vmem>>, vector<32x96xf32>
    %c64 = arith.constant 64 : index
    %c0_3 = arith.constant 0 : index
    %5 = vector.load %arg6[%c64, %c0_3] : memref<232x128xf32, #tpu.memory_space<vmem>>, vector<32x96xf32>
    %c96 = arith.constant 96 : index
    %c0_4 = arith.constant 0 : index
    %6 = vector.load %arg6[%c96, %c0_4] : memref<232x128xf32, #tpu.memory_space<vmem>>, vector<32x96xf32>
    %c128 = arith.constant 128 : index
    %c0_5 = arith.constant 0 : index
    %7 = vector.load %arg6[%c128, %c0_5] : memref<232x128xf32, #tpu.memory_space<vmem>>, vector<32x96xf32>
    %c160 = arith.constant 160 : index
    %c0_6 = arith.constant 0 : index
    %8 = vector.load %arg6[%c160, %c0_6] : memref<232x128xf32, #tpu.memory_space<vmem>>, vector<32x96xf32>
    %c192 = arith.constant 192 : index
    %c0_7 = arith.constant 0 : index
    %9 = vector.load %arg6[%c192, %c0_7] : memref<232x128xf32, #tpu.memory_space<vmem>>, vector<32x128xf32>
    %c224 = arith.constant 224 : index
    %c0_8 = arith.constant 0 : index
    %10 = vector.load %arg6[%c224, %c0_8] : memref<232x128xf32, #tpu.memory_space<vmem>>, vector<1x32xf32>
    %c225 = arith.constant 225 : index
    %c0_9 = arith.constant 0 : index
    %11 = vector.load %arg6[%c225, %c0_9] : memref<232x128xf32, #tpu.memory_space<vmem>>, vector<1x96xf32>
    %c226 = arith.constant 226 : index
    %c0_10 = arith.constant 0 : index
    %12 = vector.load %arg6[%c226, %c0_10] : memref<232x128xf32, #tpu.memory_space<vmem>>, vector<1x96xf32>
    %c227 = arith.constant 227 : index
    %c0_11 = arith.constant 0 : index
    %13 = vector.load %arg6[%c227, %c0_11] : memref<232x128xf32, #tpu.memory_space<vmem>>, vector<1x96xf32>
    %c228 = arith.constant 228 : index
    %c0_12 = arith.constant 0 : index
    %14 = vector.load %arg6[%c228, %c0_12] : memref<232x128xf32, #tpu.memory_space<vmem>>, vector<1x96xf32>
    %c229 = arith.constant 229 : index
    %c0_13 = arith.constant 0 : index
    %15 = vector.load %arg6[%c229, %c0_13] : memref<232x128xf32, #tpu.memory_space<vmem>>, vector<1x128xf32>
    %c230 = arith.constant 230 : index
    %c0_14 = arith.constant 0 : index
    %16 = vector.load %arg6[%c230, %c0_14] : memref<232x128xf32, #tpu.memory_space<vmem>>, vector<1x128xf32>
    %c0_15 = arith.constant 0 : index
    %c0_16 = arith.constant 0 : index
    %17 = vector.load %arg10[%c0_15, %c0_16] : memref<2x32xf32, #tpu.memory_space<vmem>>, vector<2x32xf32>
    %18 = vector.extract_strided_slice %17 {offsets = [0, 0], sizes = [1, 32], strides = [1, 1]} : vector<2x32xf32> to vector<1x32xf32>
    %19 = vector.extract_strided_slice %17 {offsets = [1, 0], sizes = [1, 32], strides = [1, 1]} : vector<2x32xf32> to vector<1x32xf32>
    %20 = arith.index_cast %arg0 : i32 to index
    %21 = memref.load %arg1[%20] : memref<3xi32, #tpu.memory_space<smem>>
    %22 = arith.index_cast %21 : i32 to index
    %c0_17 = arith.constant 0 : index
    %23 = vector.load %arg2[%22, %c0_17] : memref<64x32xf32, #tpu.memory_space<vmem>>, vector<1x32xf32>
    %cst = arith.constant dense<0.000000e+00> : vector<1x32xf32>
    %24 = tpu.matmul %19, %3, %cst {dimension_numbers = #tpu.dot_dimension_numbers<[1], [0], [0], [1], [0, 0, 1, 1], [], []>} : vector<1x32xf32>, vector<32x32xf32>, vector<1x32xf32> -> vector<1x32xf32>
    %25 = arith.mulf %10, %19 : vector<1x32xf32>
    %cst_18 = arith.constant dense<0.000000e+00> : vector<1xf32>
    %26 = vector.multi_reduction <add>, %25, %cst_18 [1] : vector<1x32xf32> to vector<1xf32>
    %27 = vector.shape_cast %26 : vector<1xf32> to vector<1x1xf32>
    %c0_19 = arith.constant 0 : index
    %c0_20 = arith.constant 0 : index
    %28 = vector.load %arg5[%c0_19, %c0_20] : memref<32x128xf32, #tpu.memory_space<vmem>>, vector<32x128xf32>
    %cst_21 = arith.constant dense<0.000000e+00> : vector<1x128xf32>
    %29 = tpu.matmul %24, %28, %cst_21 {dimension_numbers = #tpu.dot_dimension_numbers<[1], [0], [0], [1], [0, 0, 1, 1], [], []>} : vector<1x32xf32>, vector<32x128xf32>, vector<1x128xf32> -> vector<1x128xf32>
    %30 = vector.broadcast %27 : vector<1x1xf32> to vector<1x128xf32>
    %31 = arith.addf %29, %30 : vector<1x128xf32>
    %32 = arith.addf %31, %16 : vector<1x128xf32>
    %cst_22 = arith.constant dense<0xFF800000> : vector<1xf32>
    %33 = vector.multi_reduction <maximumf>, %32, %cst_22 [1] : vector<1x128xf32> to vector<1xf32>
    %34 = vector.shape_cast %33 : vector<1xf32> to vector<1x1xf32>
    %35 = vector.broadcast %34 : vector<1x1xf32> to vector<1x128xf32>
    %36 = arith.subf %32, %35 : vector<1x128xf32>
    %37 = math.exp %36 : vector<1x128xf32>
    %cst_23 = arith.constant dense<0.000000e+00> : vector<1xf32>
    %38 = vector.multi_reduction <add>, %37, %cst_23 [1] : vector<1x128xf32> to vector<1xf32>
    %39 = vector.shape_cast %38 : vector<1xf32> to vector<1x1xf32>
    %40 = vector.broadcast %39 : vector<1x1xf32> to vector<1x128xf32>
    %41 = arith.divf %37, %40 : vector<1x128xf32>
    %42 = arith.index_cast %arg0 : i32 to index
    %c0_24 = arith.constant 0 : index
    %43 = vector.load %arg9[%42, %c0_24] : memref<3x128xf32, #tpu.memory_space<vmem>>, vector<1x128xf32>
    tpu.vector_store %arg9[%42, %c0_24], %41 {strides = array<i32>} : memref<3x128xf32, #tpu.memory_space<vmem>>, vector<1x128xf32>,
    %c0_25 = arith.constant 0 : index
    %c0_26 = arith.constant 0 : index
    %44 = vector.load %arg4[%c0_25, %c0_26] : memref<128x32xf32, #tpu.memory_space<vmem>>, vector<128x32xf32>
    %cst_27 = arith.constant dense<0.000000e+00> : vector<1x32xf32>
    %45 = tpu.matmul %41, %44, %cst_27 {dimension_numbers = #tpu.dot_dimension_numbers<[1], [0], [0], [1], [0, 0, 1, 1], [], []>} : vector<1x128xf32>, vector<128x32xf32>, vector<1x32xf32> -> vector<1x32xf32>
    %cst_28 = arith.constant dense<0.000000e+00> : vector<1x96xf32>
    %46 = tpu.matmul %23, %4, %cst_28 {dimension_numbers = #tpu.dot_dimension_numbers<[1], [0], [0], [1], [0, 0, 1, 1], [], []>} : vector<1x32xf32>, vector<32x96xf32>, vector<1x96xf32> -> vector<1x96xf32>
    %cst_29 = arith.constant dense<0.000000e+00> : vector<1x96xf32>
    %47 = tpu.matmul %45, %5, %cst_29 {dimension_numbers = #tpu.dot_dimension_numbers<[1], [0], [0], [1], [0, 0, 1, 1], [], []>} : vector<1x32xf32>, vector<32x96xf32>, vector<1x96xf32> -> vector<1x96xf32>
    %48 = arith.addf %46, %47 : vector<1x96xf32>
    %49 = arith.addf %48, %11 : vector<1x96xf32>
    %cst_30 = arith.constant dense<0.000000e+00> : vector<1x96xf32>
    %50 = tpu.matmul %18, %6, %cst_30 {dimension_numbers = #tpu.dot_dimension_numbers<[1], [0], [0], [1], [0, 0, 1, 1], [], []>} : vector<1x32xf32>, vector<32x96xf32>, vector<1x96xf32> -> vector<1x96xf32>
    %51 = arith.addf %50, %12 : vector<1x96xf32>
    %52 = vector.extract_strided_slice %49 {offsets = [0, 0], sizes = [1, 32], strides = [1, 1]} : vector<1x96xf32> to vector<1x32xf32>
    %53 = vector.extract_strided_slice %51 {offsets = [0, 0], sizes = [1, 32], strides = [1, 1]} : vector<1x96xf32> to vector<1x32xf32>
    %54 = arith.addf %52, %53 : vector<1x32xf32>
    %55 = arith.negf %54 : vector<1x32xf32>
    %56 = math.exp %55 : vector<1x32xf32>
    %cst_31 = arith.constant 1.000000e+00 : f32
    %57 = vector.broadcast %cst_31 : f32 to vector<1x32xf32>
    %58 = arith.addf %57, %56 : vector<1x32xf32>
    %59 = arith.divf %57, %58 : vector<1x32xf32>
    %60 = vector.extract_strided_slice %49 {offsets = [0, 32], sizes = [1, 32], strides = [1, 1]} : vector<1x96xf32> to vector<1x32xf32>
    %61 = vector.extract_strided_slice %51 {offsets = [0, 32], sizes = [1, 32], strides = [1, 1]} : vector<1x96xf32> to vector<1x32xf32>
    %62 = arith.addf %60, %61 : vector<1x32xf32>
    %63 = arith.negf %62 : vector<1x32xf32>
    %64 = math.exp %63 : vector<1x32xf32>
    %cst_32 = arith.constant 1.000000e+00 : f32
    %65 = vector.broadcast %cst_32 : f32 to vector<1x32xf32>
    %66 = arith.addf %65, %64 : vector<1x32xf32>
    %67 = arith.divf %65, %66 : vector<1x32xf32>
    %68 = vector.extract_strided_slice %49 {offsets = [0, 64], sizes = [1, 32], strides = [1, 1]} : vector<1x96xf32> to vector<1x32xf32>
    %69 = vector.extract_strided_slice %51 {offsets = [0, 64], sizes = [1, 32], strides = [1, 1]} : vector<1x96xf32> to vector<1x32xf32>
    %70 = arith.mulf %59, %69 : vector<1x32xf32>
    %71 = arith.addf %68, %70 : vector<1x32xf32>
    %72 = math.tanh %71 : vector<1x32xf32>
    %cst_33 = arith.constant 1.000000e+00 : f32
    %73 = vector.broadcast %cst_33 : f32 to vector<1x32xf32>
    %74 = arith.subf %73, %67 : vector<1x32xf32>
    %75 = arith.mulf %74, %72 : vector<1x32xf32>
    %76 = arith.mulf %67, %18 : vector<1x32xf32>
    %77 = arith.addf %75, %76 : vector<1x32xf32>
    %cst_34 = arith.constant dense<0.000000e+00> : vector<1x96xf32>
    %78 = tpu.matmul %77, %7, %cst_34 {dimension_numbers = #tpu.dot_dimension_numbers<[1], [0], [0], [1], [0, 0, 1, 1], [], []>} : vector<1x32xf32>, vector<32x96xf32>, vector<1x96xf32> -> vector<1x96xf32>
    %79 = arith.addf %78, %13 : vector<1x96xf32>
    %cst_35 = arith.constant dense<0.000000e+00> : vector<1x96xf32>
    %80 = tpu.matmul %19, %8, %cst_35 {dimension_numbers = #tpu.dot_dimension_numbers<[1], [0], [0], [1], [0, 0, 1, 1], [], []>} : vector<1x32xf32>, vector<32x96xf32>, vector<1x96xf32> -> vector<1x96xf32>
    %81 = arith.addf %80, %14 : vector<1x96xf32>
    %82 = vector.extract_strided_slice %79 {offsets = [0, 0], sizes = [1, 32], strides = [1, 1]} : vector<1x96xf32> to vector<1x32xf32>
    %83 = vector.extract_strided_slice %81 {offsets = [0, 0], sizes = [1, 32], strides = [1, 1]} : vector<1x96xf32> to vector<1x32xf32>
    %84 = arith.addf %82, %83 : vector<1x32xf32>
    %85 = arith.negf %84 : vector<1x32xf32>
    %86 = math.exp %85 : vector<1x32xf32>
    %cst_36 = arith.constant 1.000000e+00 : f32
    %87 = vector.broadcast %cst_36 : f32 to vector<1x32xf32>
    %88 = arith.addf %87, %86 : vector<1x32xf32>
    %89 = arith.divf %87, %88 : vector<1x32xf32>
    %90 = vector.extract_strided_slice %79 {offsets = [0, 32], sizes = [1, 32], strides = [1, 1]} : vector<1x96xf32> to vector<1x32xf32>
    %91 = vector.extract_strided_slice %81 {offsets = [0, 32], sizes = [1, 32], strides = [1, 1]} : vector<1x96xf32> to vector<1x32xf32>
    %92 = arith.addf %90, %91 : vector<1x32xf32>
    %93 = arith.negf %92 : vector<1x32xf32>
    %94 = math.exp %93 : vector<1x32xf32>
    %cst_37 = arith.constant 1.000000e+00 : f32
    %95 = vector.broadcast %cst_37 : f32 to vector<1x32xf32>
    %96 = arith.addf %95, %94 : vector<1x32xf32>
    %97 = arith.divf %95, %96 : vector<1x32xf32>
    %98 = vector.extract_strided_slice %79 {offsets = [0, 64], sizes = [1, 32], strides = [1, 1]} : vector<1x96xf32> to vector<1x32xf32>
    %99 = vector.extract_strided_slice %81 {offsets = [0, 64], sizes = [1, 32], strides = [1, 1]} : vector<1x96xf32> to vector<1x32xf32>
    %100 = arith.mulf %89, %99 : vector<1x32xf32>
    %101 = arith.addf %98, %100 : vector<1x32xf32>
    %102 = math.tanh %101 : vector<1x32xf32>
    %cst_38 = arith.constant 1.000000e+00 : f32
    %103 = vector.broadcast %cst_38 : f32 to vector<1x32xf32>
    %104 = arith.subf %103, %97 : vector<1x32xf32>
    %105 = arith.mulf %104, %102 : vector<1x32xf32>
    %106 = arith.mulf %97, %19 : vector<1x32xf32>
    %107 = arith.addf %105, %106 : vector<1x32xf32>
    %c0_39 = arith.constant 0 : index
    %c0_40 = arith.constant 0 : index
    %108 = vector.load %arg10[%c0_39, %c0_40] : memref<2x32xf32, #tpu.memory_space<vmem>>, vector<1x32xf32>
    tpu.vector_store %arg10[%c0_39, %c0_40], %77 {strides = array<i32>} : memref<2x32xf32, #tpu.memory_space<vmem>>, vector<1x32xf32>,
    %c1 = arith.constant 1 : index
    %c0_41 = arith.constant 0 : index
    %109 = vector.load %arg10[%c1, %c0_41] : memref<2x32xf32, #tpu.memory_space<vmem>>, vector<1x32xf32>
    tpu.vector_store %arg10[%c1, %c0_41], %107 {strides = array<i32>} : memref<2x32xf32, #tpu.memory_space<vmem>>, vector<1x32xf32>,
    %cst_42 = arith.constant dense<0.000000e+00> : vector<1x128xf32>
    %110 = tpu.matmul %107, %9, %cst_42 {dimension_numbers = #tpu.dot_dimension_numbers<[1], [0], [0], [1], [0, 0, 1, 1], [], []>} : vector<1x32xf32>, vector<32x128xf32>, vector<1x128xf32> -> vector<1x128xf32>
    %111 = arith.addf %110, %15 : vector<1x128xf32>
    %cst_43 = arith.constant dense<0xFF800000> : vector<1xf32>
    %112 = vector.multi_reduction <maximumf>, %111, %cst_43 [1] : vector<1x128xf32> to vector<1xf32>
    %113 = vector.shape_cast %112 : vector<1xf32> to vector<1x1xf32>
    %114 = vector.broadcast %113 : vector<1x1xf32> to vector<1x128xf32>
    %115 = arith.subf %111, %114 : vector<1x128xf32>
    %116 = math.exp %115 : vector<1x128xf32>
    %cst_44 = arith.constant dense<0.000000e+00> : vector<1xf32>
    %117 = vector.multi_reduction <add>, %116, %cst_44 [1] : vector<1x128xf32> to vector<1xf32>
    %118 = vector.shape_cast %117 : vector<1xf32> to vector<1x1xf32>
    %119 = math.log %118 : vector<1x1xf32>
    %120 = arith.addf %119, %113 : vector<1x1xf32>
    %121 = vector.broadcast %120 : vector<1x1xf32> to vector<1x128xf32>
    %122 = arith.subf %111, %121 : vector<1x128xf32>
    %123 = arith.index_cast %arg0 : i32 to index
    %c0_45 = arith.constant 0 : index
    %124 = vector.load %arg7[%123, %c0_45] : memref<3x128xf32, #tpu.memory_space<vmem>>, vector<1x128xf32>
    tpu.vector_store %arg7[%123, %c0_45], %122 {strides = array<i32>} : memref<3x128xf32, #tpu.memory_space<vmem>>, vector<1x128xf32>,
    %c2_i32 = arith.constant 2 : i32
    %125 = arith.cmpi eq, %arg0, %c2_i32 : i32
    %126 = arith.extui %125 : i1 to i32
    %c0_i32_46 = arith.constant 0 : i32
    %127 = arith.cmpi ne, %126, %c0_i32_46 : i32
    scf.if %127 {
      %c0_47 = arith.constant 0 : index
      %c0_48 = arith.constant 0 : index
      %128 = vector.load %arg8[%c0_47, %c0_48] : memref<2x32xf32, #tpu.memory_space<vmem>>, vector<1x32xf32>
      tpu.vector_store %arg8[%c0_47, %c0_48], %77 {strides = array<i32>} : memref<2x32xf32, #tpu.memory_space<vmem>>, vector<1x32xf32>,
      %c1_49 = arith.constant 1 : index
      %c0_50 = arith.constant 0 : index
      %129 = vector.load %arg8[%c1_49, %c0_50] : memref<2x32xf32, #tpu.memory_space<vmem>>, vector<1x32xf32>
      tpu.vector_store %arg8[%c1_49, %c0_50], %107 {strides = array<i32>} : memref<2x32xf32, #tpu.memory_space<vmem>>, vector<1x32xf32>,
    } else {
    }
    return
  }
  func.func @transform_0(%arg0: i32, %arg1: memref<3xi32, #tpu.memory_space<smem>>) -> (i32, i32) {
    %c0_i32 = arith.constant 0 : i32
    %c0_i32_0 = arith.constant 0 : i32
    %c0_i32_1 = arith.constant 0 : i32
    return %c0_i32, %c0_i32_0 : i32, i32
  }
  func.func @transform_1(%arg0: i32, %arg1: memref<3xi32, #tpu.memory_space<smem>>) -> (i32, i32) {
    %c0_i32 = arith.constant 0 : i32
    %c0_i32_0 = arith.constant 0 : i32
    %c0_i32_1 = arith.constant 0 : i32
    return %c0_i32, %c0_i32_0 : i32, i32
  }
  func.func @transform_2(%arg0: i32, %arg1: memref<3xi32, #tpu.memory_space<smem>>) -> (i32, i32) {
    %c0_i32 = arith.constant 0 : i32
    %c0_i32_0 = arith.constant 0 : i32
    %c0_i32_1 = arith.constant 0 : i32
    return %c0_i32, %c0_i32_0 : i32, i32
  }
  func.func @transform_3(%arg0: i32, %arg1: memref<3xi32, #tpu.memory_space<smem>>) -> (i32, i32) {
    %c0_i32 = arith.constant 0 : i32
    %c0_i32_0 = arith.constant 0 : i32
    %c0_i32_1 = arith.constant 0 : i32
    return %c0_i32, %c0_i32_0 : i32, i32
  }
  func.func @transform_4(%arg0: i32, %arg1: memref<3xi32, #tpu.memory_space<smem>>) -> (i32, i32) {
    %c0_i32 = arith.constant 0 : i32
    %c0_i32_0 = arith.constant 0 : i32
    %c0_i32_1 = arith.constant 0 : i32
    return %c0_i32, %c0_i32_0 : i32, i32
  }
  func.func @transform_5(%arg0: i32, %arg1: memref<3xi32, #tpu.memory_space<smem>>) -> (i32, i32) {
    %c0_i32 = arith.constant 0 : i32
    %c0_i32_0 = arith.constant 0 : i32
    %c0_i32_1 = arith.constant 0 : i32
    return %c0_i32, %c0_i32_0 : i32, i32
  }
  func.func @transform_6(%arg0: i32, %arg1: memref<3xi32, #tpu.memory_space<smem>>) -> (i32, i32) {
    %c0_i32 = arith.constant 0 : i32
    %c0_i32_0 = arith.constant 0 : i32
    %c0_i32_1 = arith.constant 0 : i32
    return %c0_i32, %c0_i32_0 : i32, i32
  }
  func.func @transform_7(%arg0: i32, %arg1: memref<3xi32, #tpu.memory_space<smem>>) -> (i32, i32) {
    %c0_i32 = arith.constant 0 : i32
    %c0_i32_0 = arith.constant 0 : i32
    %c0_i32_1 = arith.constant 0 : i32
    return %c0_i32, %c0_i32_0 : i32, i32
  }
}

</mosaic_0001>

<bundles_post_ra>
// kernel: bahdanau_decoder_steps.1
= control target key start
LH: loop header
LB: loop body
LE: loop exit
PB: predicated region body
PF: predicated region fallthrough
CT: control target
= control target key end

     0   :  { %s1851_s0 = inlined_call_operand.vmem [shape: s32[3], index: 0, kind: input, shape index: {}]   ;;  %s1852_s1 = inlined_call_operand.vmem [shape: f32[64,32], index: 1, kind: input, shape index: {}]   ;;  %s1853_s2 = inlined_call_operand.vmem [shape: f32[2,32], index: 2, kind: input, shape index: {}]   ;;  %s1854_s3 = inlined_call_operand.vmem [shape: f32[128,32], index: 3, kind: input, shape index: {}]   ;;  %s1855_s4 = inlined_call_operand.vmem [shape: f32[32,128], index: 4, kind: input, shape index: {}]   ;;  %s1856_s5 = inlined_call_operand.vmem [shape: f32[232,128], index: 5, kind: input, shape index: {}]   ;;  %s1857_s6 = inlined_call_operand.hbm [shape: f32[3,128], index: 6, kind: output, shape index: {0}]   ;;  %s1858_s7 = inlined_call_operand.hbm [shape: f32[2,32], index: 7, kind: output, shape index: {1}]   ;;  %s1859_s8 = inlined_call_operand.vmem [shape: f32[3,128], index: 8, kind: output, shape index: {2}]  }
   0x1   :  { %s14_s29 = sshll.u32 %s1851_s0, 4  ;;  %s15_s29 = int_to_ptr.vmem [resolvable:$true] %s14_s29 }
   0x2   :  { %s1393_s30 = scalar_lea.vmem %s15_s29, 16  ;;  %p1398_p1 = scmp.lt.s32.totalorder %s15_s29, %s15_s29 }
   0x3   :  { %p1394_p0 = scmp.ne.s32.totalorder %s15_s29, %s1393_s30  ;;  %p1399_p2 = scmp.lt.s32.totalorder %s1393_s30, %s1393_s30 }
   0x5   :  { %p1400_p3 = por %p1399_p2, %p1398_p1 }
   0x7   :  { %p1401_p4 = pnand %p1400_p3, %p1394_p0 }
   0x9   :  { %1404 = shalt.err (!%p1401_p4)  }
   0xa   :  { %s1471_s9 = smov [#allocation4]  }
   0xb   :  { %17 = dma.vmem_to_smem %s15_s29, 16, %s1471_s9, [#allocation3] }
   0xc   :  { %1457 = dma.done.wait [#allocation3], 16 }
   0xd   :  { %1458 = vsyncadd [#allocation3], 4294967280 }
   0xe   :  { %19 = sfence }
   0xf   :  { %20 = vsyncpa [#allocation6], 0 }
  0x10   :  { %21 = vsyncpa [#allocation8], 0  ;;  %s1527_s10 = smov 0  }
  0x11 LB: > { %s1533_s0 = sadd.s32 4294967295, %s1469_s10   ;;  %p1142_p5 = scmp.ge.s32.totalorder %s1469_s10, 1  ;;  %s1469_s10 = sphi %s1527_s10, %s27_s10  }
  0x12   : > { %p226_p6 = scmp.lt.s32.totalorder %s1469_s10, 4 }
  0x14   : > { %p227_p7 = pnand %p1142_p5, %p226_p6 }
  0x15   : > { %p1143_p8 = scmp.ne.s32.totalorder (!%p227_p7), %s1533_s0, 0 }
  0x16   : > { %230 = sbr.rel (%p227_p7) target bundleno = 2772 (0xad4), region = 40 }
  0x1b   : > { %251 = sbr.rel (%p1143_p8) target bundleno = 34 (0x22), region = 44 }
  0x20   : > { %v252_v0 = vld [vmem:[%s1853_s2] sm:$0x3]  ;;  %vm253_vm0 = vcmask 254976  }
  0x21   : > { %254 = vst.msk [vmem:[#allocation2] sm:$0x3] %vm253_vm0, %v252_v0 }
  0x22 PF: > { %v258_v1 = vld [vmem:[%s1856_s5 + $0x18] sm:$0xff]  ;;  %v1472_v2 = vmov 0.0   ;;  %v257_v3 = vld [vmem:[%s1856_s5 + $0x10] sm:$0xff]  ;;  %vm1473_vm1 = vmmov 0   ;;  %v256_v7 = vld [vmem:[%s1856_s5 + $0x8] sm:$0xff]  ;;  %vm296_vm2 = vcmask 261120   ;;  %s465_s12 = scalar_lea.vmem %s1859_s8, %s1533_s0 }
  0x23   : > { %1222 = vmatprep.subr.mxu0 %v1472_v2  ;;  %1230 = vmatprep.mubr.msk.f32.mxu0 %vm1473_vm1, %v1472_v2  ;;  %v378_v4 = vld [vmem:[%s1855_s4 + $0x18] sm:$0xff]  ;;  %v377_v6 = vld [vmem:[%s1855_s4 + $0x10] sm:$0xff]  ;;  %v376_v8 = vld [vmem:[%s1855_s4 + $0x8] sm:$0xff]  ;;  %vm371_vm3 = vcmask 253952   ;;  %vm453_vm4 = vcmask 1040384   ;;  %s291_s13 = sld [smem:[#allocation4 + %s1533_s0]] }
  0x24   : > { %1223 = vmatpush3.msra.mxu0 %v258_v1  ;;  %1233 = vmatprep.subr.mxu1 %v1472_v2  ;;  %v255_v9 = vld [vmem:[%s1856_s5] sm:$0xff]  ;;  %v482_v24 = vld [vmem:[%s1854_s3 + $0x78] sm:$0xff]  ;;  %v481_v25 = vld [vmem:[%s1854_s3 + $0x70] sm:$0xff]  ;;  %s1474_s14 = smov 64   ;;  %s1475_s9 = smov 96  }
  0x25   : > { %1224 = vmatprep.subr.mxu0 %v1472_v2  ;;  %1234 = vmatpush3.msra.mxu1 %v378_v4  ;;  %v375_v11 = vld [vmem:[%s1855_s4] sm:$0xff]  ;;  %v480_v26 = vld [vmem:[%s1854_s3 + $0x68] sm:$0xff]  ;;  %v478_v28 = vld [vmem:[%s1854_s3 + $0x58] sm:$0xff]  ;;  %s1162_s28 = scalar_lea.vmem [#allocation5], %s1469_s10  ;;  %p1155_p9 = scmp.ne.s32.totalorder %s1533_s0, 2 }
  0x26   : > { %1225 = vmatpush3.msra.mxu0 %v257_v3  ;;  %1235 = vmatprep.subr.mxu1 %v1472_v2  ;;  %v283_v12 = vld [vmem:[%s1856_s5 + $0xe0] sm:$0x1]  ;;  %v289_v19 = vld [vmem:[%s1856_s5 + $0xe6] sm:$0x1]  ;;  %v477_v29 = vld [vmem:[%s1854_s3 + $0x50] sm:$0xff] }
  0x27   : > { %1226 = vmatprep.subr.mxu0 %v1472_v2  ;;  %1236 = vmatpush3.msra.mxu1 %v377_v6  ;;  %v479_v27 = vld [vmem:[%s1854_s3 + $0x60] sm:$0xff]  ;;  %v476_v30 = vld [vmem:[%s1854_s3 + $0x48] sm:$0xff]  ;;  %v474_v37 = vld [vmem:[%s1854_s3 + $0x38] sm:$0xff] }
  0x28   : > { %v1553_v5 = vld [vmem:[#allocation2] sm:$0x3]  ;;  %1227 = vmatpush3.msra.mxu0 %v256_v7  ;;  %1237 = vmatprep.subr.mxu1 %v1472_v2  ;;  %v473_v38 = vld [vmem:[%s1854_s3 + $0x30] sm:$0xff]  ;;  %v472_v39 = vld [vmem:[%s1854_s3 + $0x28] sm:$0xff] }
  0x29   : > { %v1572_v10 = vrot.slane %v1553_v5, 1  ;;  %1228 = vmatprep.subr.mxu0 %v1472_v2  ;;  %1238 = vmatpush3.msra.mxu1 %v376_v8  ;;  %v475_v31 = vld [vmem:[%s1854_s3 + $0x40] sm:$0xff]  ;;  %v470_v41 = vld [vmem:[%s1854_s3 + $0x18] sm:$0xff]  ;;  %v469_v42 = vld [vmem:[%s1854_s3 + $0x10] sm:$0xff]  ;;  %s292_s22 = scalar_lea.vmem %s1852_s1, %s291_s13  ;;  %s1476_s13 = smov 32  }
  0x2a   : > { %1229 = vmatpush3.msra.mxu0 %v255_v9  ;;  %1239 = vmatprep.subr.mxu1 %v1472_v2  ;;  %v471_v40 = vld [vmem:[%s1854_s3 + $0x20] sm:$0xff]  ;;  %v468_v43 = vld [vmem:[%s1854_s3 + $0x8] sm:$0xff]  ;;  %v266_v45 = vld [vmem:[%s1856_s5 + $0x58] sm:$0xff] }
  0x2b   : > { %1231 = vmatmul.mubr.msk.f32.vlgmr.msra.gmra.mxu0 %vm296_vm2, %v1572_v10  ;;  %1241 = vmatprep.mubr.msk.f32.mxu1 %vm1473_vm1, %v1472_v2  ;;  %v370_v13 = vmul.f32 %v1572_v10, %v283_v12  ;;  %v467_v44 = vld [vmem:[%s1854_s3] sm:$0xff]  ;;  %v265_v46 = vld [vmem:[%s1856_s5 + $0x50] sm:$0xff]  ;;  %v264_v47 = vld [vmem:[%s1856_s5 + $0x48] sm:$0xff] }
  0x2c   : > { %1244 = vmatprep.subr.mxu0 %v1472_v2  ;;  %1276 = vmatprep.mubr.msk.f32.mxu0 %vm1473_vm1, %v1472_v2  ;;  %v263_v48 = vld [vmem:[%s1856_s5 + $0x40] sm:$0xff]  ;;  %v262_v52 = vld [vmem:[%s1856_s5 + $0x38] sm:$0xff]  ;;  %v261_v54 = vld [vmem:[%s1856_s5 + $0x30] sm:$0xff] }
  0x2d   : > { %1240 = vmatpush3.msra.mxu1 %v375_v11  ;;  %v372_v14 = vsel %vm371_vm3, %v370_v13, 0.0  ;;  %1245 = vmatpush3.msra.mxu0 %v482_v24  ;;  %v260_v56 = vld [vmem:[%s1856_s5 + $0x28] sm:$0xff]  ;;  %v259_v57 = vld [vmem:[%s1856_s5 + $0x20] sm:$0xff]  ;;  %v270_v59 = vld [vmem:[%s1856_s5 + $0x78] sm:$0xff] }
  0x2e   : > { %1279 = vmatprep.subr.mxu1 %v1472_v2  ;;  %373 = vadd.xlane.f32.xlu0 %v372_v14  ;;  %v293_v58 = vld [vmem:[%s292_s22] sm:$0x1]  ;;  %v269_v60 = vld [vmem:[%s1856_s5 + $0x70] sm:$0xff]  ;;  %v268_v61 = vld [vmem:[%s1856_s5 + $0x68] sm:$0xff] }
  0x2f   : > { %1246 = vmatprep.subr.mxu0 %v1472_v2  ;;  %v267_v62 = vld [vmem:[%s1856_s5 + $0x60] sm:$0xff]  ;;  %v274_v24 = vld [vmem:[%s1856_s5 + $0x98] sm:$0xff] }
  0x30   : > { %1247 = vmatpush3.msra.mxu0 %v481_v25  ;;  %v285_v6 = vld [vmem:[%s1856_s5 + $0xe2] sm:$0x1]  ;;  %v284_v11 = vld [vmem:[%s1856_s5 + $0xe1] sm:$0x1]  ;;  %v273_v25 = vld [vmem:[%s1856_s5 + $0x90] sm:$0xff] }
  0x31   : > { %1248 = vmatprep.subr.mxu0 %v1472_v2 }
  0x32   : > { %1249 = vmatpush3.msra.mxu0 %v480_v26  ;;  %v276_v26 = vld [vmem:[%s1856_s5 + $0xa8] sm:$0xff] }
  0x33   : > { %1250 = vmatprep.subr.mxu0 %v1472_v2 }
  0x34   : > { %1251 = vmatpush3.msra.mxu0 %v479_v27 }
  0x35   : > { %1252 = vmatprep.subr.mxu0 %v1472_v2 }
  0x36   : > { %1253 = vmatpush3.msra.mxu0 %v478_v28  ;;  %v275_v28 = vld [vmem:[%s1856_s5 + $0xa0] sm:$0xff] }
  0x37   : > { %1254 = vmatprep.subr.mxu0 %v1472_v2 }
  0x38   : > { %1255 = vmatpush3.msra.mxu0 %v477_v29  ;;  %v272_v29 = vld [vmem:[%s1856_s5 + $0x88] sm:$0xff] }
  0x39   : > { %1256 = vmatprep.subr.mxu0 %v1472_v2 }
  0x3a   : > { %1257 = vmatpush3.msra.mxu0 %v476_v30  ;;  %v271_v30 = vld [vmem:[%s1856_s5 + $0x80] sm:$0xff] }
  0x3b   : > { %1258 = vmatprep.subr.mxu0 %v1472_v2 }
  0x3c   : > { %1259 = vmatpush3.msra.mxu0 %v475_v31 }
  0x3d   : > { %1260 = vmatprep.subr.mxu0 %v1472_v2 }
  0x3e   : > { %1261 = vmatpush3.msra.mxu0 %v474_v37  ;;  %v287_v37 = vld [vmem:[%s1856_s5 + $0xe4] sm:$0x1] }
  0x3f   : > { %1262 = vmatprep.subr.mxu0 %v1472_v2 }
  0x40   : > { %1263 = vmatpush3.msra.mxu0 %v473_v38 }
  0x41   : > { %1264 = vmatprep.subr.mxu0 %v1472_v2 }
  0x42   : > { %1265 = vmatpush3.msra.mxu0 %v472_v39 }
  0x43   : > { %1266 = vmatprep.subr.mxu0 %v1472_v2 }
  0x44   : > { %1267 = vmatpush3.msra.mxu0 %v471_v40 }
  0x45   : > { %1268 = vmatprep.subr.mxu0 %v1472_v2 }
  0x46   : > { %1269 = vmatpush3.msra.mxu0 %v470_v41  ;;  %v286_v41 = vld [vmem:[%s1856_s5 + $0xe3] sm:$0x1] }
  0x47   : > { %1270 = vmatprep.subr.mxu0 %v1472_v2 }
  0x48   : > { %1271 = vmatpush3.msra.mxu0 %v469_v42 }
  0x49   : > { %1272 = vmatprep.subr.mxu0 %v1472_v2 }
  0x4a   : > { %1273 = vmatpush3.msra.mxu0 %v468_v43 }
  0x4b   : > { %1274 = vmatprep.subr.mxu0 %v1472_v2 }
  0x4c   : > { %1275 = vmatpush3.msra.mxu0 %v467_v44 }
  0x4d   : > { %1323 = vmatprep.subr.mxu0 %v1472_v2 }
  0xb7   : > { %v374_v17 = vpop.xlane.xlu0 %373 }
  0xeb   : > { %v365_v15 = vpop.f32.mrf.mxu0 }
  0xec   : > { %1242 = vmatmul.mubr.msk.f32.vlgmr.msra.gmra.mxu1 %vm296_vm2, %v365_v15 }
  0xed   : > { %v1232_v16 = vpop.f32.mrf.mxu0  ;;  %1287 = vmatprep.mubr.msk.f32.mxu1 %vm1473_vm1, %v1472_v2  ;;  %1280 = vmatpush3.msra.mxu1 %v266_v45 }
  0xee   : > { %1281 = vmatprep.subr.mxu1 %v1472_v2 }
  0xef   : > { %1282 = vmatpush3.msra.mxu1 %v265_v46 }
  0xf0   : > { %1283 = vmatprep.subr.mxu1 %v1472_v2 }
  0xf1   : > { %1284 = vmatpush3.msra.mxu1 %v264_v47 }
  0xf2   : > { %1285 = vmatprep.subr.mxu1 %v1472_v2 }
  0xf3   : > { %1286 = vmatpush3.msra.mxu1 %v263_v48 }
  0xf4   : > { %1290 = vmatprep.subr.mxu1 %v1472_v2 }
 0x1ac   : > { %v448_v18 = vpop.f32.mrf.mxu1 }
 0x1ad   : > { %v449_v20 = vadd.f32 %v448_v18, %v374_v17 }
 0x1ae   : > { %v1243_v21 = vpop.f32.mrf.mxu1 }
 0x1af   : > { %v452_v22 = vadd.f32 %v449_v20, %v289_v19 }
 0x1b1   : > { %v454_v23 = vsel %vm453_vm4, %v452_v22, -inf }
 0x1b2   : > { %455 = vmax.xlane.f32.xlu0 %v454_v23  ;;  %v277_v23 = vld [vmem:[%s1856_s5 + $0xb0] sm:$0xff] }
 0x23b   : > { %v456_v32 = vpop.xlane.xlu0 %455 }
 0x23c   : > { %v457_v33 = vsub.f32 %v452_v22, %v456_v32  ;;  %v278_v22 = vld [vmem:[%s1856_s5 + $0xb8] sm:$0xff] }
 0x23e   : > { %v458_v34 = vmul.f32 1.442695, %v457_v33 }
 0x240   : > { %1373 = vpow2.f32 %v458_v34 }
 0x24d   : > { %v1374_v35 = vpop.eup %1373 }
 0x24e   : > { %v460_v36 = vsel %vm453_vm4, %v1374_v35, 0.0 }
 0x24f   : > { %461 = vadd.xlane.f32.xlu1 %v460_v36 }
 0x2d8   : > { %v462_v49 = vpop.xlane.xlu1 %461 }
 0x2d9   : > { %1375 = vrcp.f32 %v462_v49 }
 0x2e6   : > { %v1376_v50 = vpop.eup %1375 }
 0x2e7   : > { %v464_v51 = vmul.f32 %v1376_v50, %v1374_v35 }
 0x2e9   : > { %466 = vst [vmem:[%s465_s12] sm:$0x1] %v464_v51  ;;  %1277 = vmatmul.mubr.f32.vlgmr.msra.gmra.mxu0 %v464_v51 }
 0x2ea   : > { %1331 = vmatprep.mubr.msk.f32.mxu0 %vm1473_vm1, %v1472_v2  ;;  %1324 = vmatpush3.msra.mxu0 %v278_v22 }
 0x2eb   : > { %1325 = vmatprep.subr.mxu0 %v1472_v2 }
 0x2ec   : > { %1326 = vmatpush3.msra.mxu0 %v277_v23 }
 0x2ed   : > { %1327 = vmatprep.subr.mxu0 %v1472_v2 }
 0x2ee   : > { %1328 = vmatpush3.msra.mxu0 %v276_v26 }
 0x2ef   : > { %1329 = vmatprep.subr.mxu0 %v1472_v2 }
 0x2f0   : > { %1330 = vmatpush3.msra.mxu0 %v275_v28 }
 0x2f1   : > { %1332 = vmatmul.mubr.msk.f32.vlgmr.msra.gmra.mxu0 %vm296_vm2, %v1572_v10 }
 0x3a9   : > { %v549_v53 = vpop.f32.mrf.mxu0 }
 0x3aa   : > { %1288 = vmatmul.mubr.msk.f32.vlgmr.msra.gmra.mxu1 %vm296_vm2, %v549_v53 }
 0x3ab   : > { %1291 = vmatpush3.msra.mxu1 %v262_v52  ;;  %v1278_v55 = vpop.f32.mrf.mxu0  ;;  %1298 = vmatprep.mubr.msk.f32.mxu1 %vm1473_vm1, %v1472_v2 }
 0x3ac   : > { %1292 = vmatprep.subr.mxu1 %v1472_v2  ;;  %v281_v55 = vld [vmem:[%s1856_s5 + $0xd0] sm:$0xff] }
 0x3ad   : > { %1293 = vmatpush3.msra.mxu1 %v261_v54  ;;  %v282_v54 = vld [vmem:[%s1856_s5 + $0xd8] sm:$0xff] }
 0x3ae   : > { %1294 = vmatprep.subr.mxu1 %v1472_v2 }
 0x3af   : > { %1295 = vmatpush3.msra.mxu1 %v260_v56  ;;  %v280_v56 = vld [vmem:[%s1856_s5 + $0xc8] sm:$0xff] }
 0x3b0   : > { %1296 = vmatprep.subr.mxu1 %v1472_v2 }
 0x3b1   : > { %1297 = vmatpush3.msra.mxu1 %v259_v57  ;;  %v942_v38 = vpop.f32.mrf.mxu0 }
 0x3b2   : > { %1299 = vmatmul.mubr.msk.f32.vlgmr.msra.gmra.mxu1 %vm296_vm2, %v293_v58  ;;  %1301 = vmatprep.subr.mxu1 %v1472_v2  ;;  %v943_v39 = vadd.f32 %v942_v38, %v287_v37 }
 0x3b3   : > { %1302 = vmatpush3.msra.mxu1 %v270_v59  ;;  %1309 = vmatprep.mubr.msk.f32.mxu1 %vm1473_vm1, %v1472_v2  ;;  %v1333_v40 = vpop.f32.mrf.mxu0 }
 0x3b4   : > { %1303 = vmatprep.subr.mxu1 %v1472_v2 }
 0x3b5   : > { %1304 = vmatpush3.msra.mxu1 %v269_v60 }
 0x3b6   : > { %1305 = vmatprep.subr.mxu1 %v1472_v2 }
 0x3b7   : > { %1306 = vmatpush3.msra.mxu1 %v268_v61 }
 0x3b8   : > { %1307 = vmatprep.subr.mxu1 %v1472_v2 }
 0x3b9   : > { %1308 = vmatpush3.msra.mxu1 %v267_v62 }
 0x3ba   : > { %1310 = vmatmul.mubr.msk.f32.vlgmr.msra.gmra.mxu1 %vm296_vm2, %v1553_v5  ;;  %1312 = vmatprep.subr.mxu1 %v1472_v2 }
 0x3bb   : > { %1320 = vmatprep.mubr.msk.f32.mxu1 %vm1473_vm1, %v1472_v2  ;;  %1313 = vmatpush3.msra.mxu1 %v274_v24 }
 0x3bc   : > { %1314 = vmatprep.subr.mxu1 %v1472_v2 }
 0x3bd   : > { %1315 = vmatpush3.msra.mxu1 %v273_v25 }
 0x3be   : > { %1316 = vmatprep.subr.mxu1 %v1472_v2 }
 0x3bf   : > { %1317 = vmatpush3.msra.mxu1 %v272_v29 }
 0x3c0   : > { %1318 = vmatprep.subr.mxu1 %v1472_v2 }
 0x3c1   : > { %1319 = vmatpush3.msra.mxu1 %v271_v30 }
 0x3c2   : > { %1334 = vmatprep.subr.mxu1 %v1472_v2 }
 0x46a   : > { %v622_v63 = vpop.f32.mrf.mxu1 }
 0x46c   : > { %v1289_v0 = vpop.f32.mrf.mxu1 }
 0x472   : > { %v695_v1 = vpop.f32.mrf.mxu1 }
 0x473   : > { %v696_v3 = vadd.f32 %v695_v1, %v622_v63 }
 0x474   : > { %v1300_v4 = vpop.f32.mrf.mxu1 }
 0x475   : > { %v699_v12 = vadd.f32 %v696_v3, %v284_v11 }
 0x47a   : > { %v768_v7 = vpop.f32.mrf.mxu1 }
 0x47b   : > { %v769_v8 = vadd.f32 %v768_v7, %v285_v6 }
 0x47c   : > { %v1311_v9 = vpop.f32.mrf.mxu1 }
 0x47d   : > { %780 = vrot.lane.b32.xlu1 %v769_v8, %s1474_s14  ;;  %v772_v13 = vadd.f32 %v769_v8, %v699_v12 }
 0x47f   : > { %v1149_v14 = vmul.f32 -1.442695, %v772_v13 }
 0x481   : > { %1377 = vpow2.f32 %v1149_v14 }
 0x48e   : > { %v1378_v15 = vpop.eup %1377 }
 0x48f   : > { %v776_v16 = vadd.f32 1.0, %v1378_v15 }
 0x491   : > { %1379 = vrcp.f32 %v776_v16 }
 0x49e   : > { %v1380_v17 = vpop.eup %1379 }
 0x49f   : > { %v790_v32 = vsub.f32 1.0, %v1380_v17 }
 0x4ef   : > { %v781_v18 = vpop.permute.xlu1 %780 }
 0x4f0   : > { %v783_v19 = vmul.f32 %v1380_v17, %v781_v18 }
 0x4f2   : > { %785 = vrot.lane.b32.xlu0 %v783_v19, %s1474_s14 }
 0x4f6   : > { %954 = vrot.lane.b32.xlu0 %v943_v39, %s1474_s14 }
 0x564   : > { %v786_v20 = vpop.permute.xlu0 %785 }
 0x565   : > { %v788_v21 = vadd.f32 %v786_v20, %v699_v12 }
 0x567   : > { %1381 = vtanh.f32 %v788_v21 }
 0x568   : > { %v955_v49 = vpop.permute.xlu0 %954 }
 0x574   : > { %v1382_v27 = vpop.eup %1381 }
 0x575   : > { %792 = vrot.lane.b32.xlu1 %v1382_v27, %s1475_s9 }
 0x579   : > { %796 = vrot.lane.b32.xlu1 %v1553_v5, %s1476_s13 }
 0x5e7   : > { %v793_v31 = vpop.permute.xlu1 %792 }
 0x5e8   : > { %v795_v34 = vmul.f32 %v793_v31, %v790_v32 }
 0x5eb   : > { %v797_v33 = vpop.permute.xlu1 %796 }
 0x5ec   : > { %v799_v35 = vmul.f32 %v1380_v17, %v797_v33 }
 0x5ee   : > { %v800_v36 = vadd.f32 %v799_v35, %v795_v34 }
 0x5f0   : > { %802 = vrot.lane.b32.xlu1 %v800_v36, %s1475_s9 }
 0x662   : > { %v1782_v5 = vpop.permute.xlu1 %802 }
 0x663   : > { %976 = vst.msk [vmem:[#allocation2] sm:$0x1] %vm371_vm3, %v1782_v5  ;;  %1321 = vmatmul.mubr.msk.f32.vlgmr.msra.gmra.mxu1 %vm296_vm2, %v1782_v5 }
 0x664   : > { %1342 = vmatprep.mubr.msk.f32.mxu1 %vm1473_vm1, %v1472_v2  ;;  %1335 = vmatpush3.msra.mxu1 %v282_v54 }
 0x665   : > { %1336 = vmatprep.subr.mxu1 %v1472_v2 }
 0x666   : > { %1337 = vmatpush3.msra.mxu1 %v281_v55 }
 0x667   : > { %1338 = vmatprep.subr.mxu1 %v1472_v2 }
 0x668   : > { %1339 = vmatpush3.msra.mxu1 %v280_v56 }
 0x669   : > { %1340 = vmatprep.subr.mxu1 %v1472_v2  ;;  %v288_v2 = vld [vmem:[%s1856_s5 + $0xe5] sm:$0x1] }
 0x723   : > { %v872_v42 = vpop.f32.mrf.mxu1 }
 0x724   : > { %v873_v43 = vadd.f32 %v872_v42, %v286_v41 }
 0x725   : > { %v1322_v44 = vpop.f32.mrf.mxu1 }
 0x726   : > { %v946_v45 = vadd.f32 %v943_v39, %v873_v43 }
 0x728   : > { %v1152_v46 = vmul.f32 -1.442695, %v946_v45 }
 0x72a   : > { %1383 = vpow2.f32 %v1152_v46 }
 0x737   : > { %v1384_v47 = vpop.eup %1383 }
 0x738   : > { %v950_v48 = vadd.f32 1.0, %v1384_v47 }
 0x73a   : > { %1385 = vrcp.f32 %v950_v48 }
 0x747   : > { %v1386_v50 = vpop.eup %1385 }
 0x748   : > { %v957_v51 = vmul.f32 %v1386_v50, %v955_v49  ;;  %v964_v59 = vsub.f32 1.0, %v1386_v50 }
 0x74a   : > { %959 = vrot.lane.b32.xlu1 %v957_v51, %s1474_s14 }
 0x74e   : > { %970 = vrot.lane.b32.xlu1 %v1572_v10, %s1476_s13  ;;  %v279_v10 = vld [vmem:[%s1856_s5 + $0xc0] sm:$0xff] }
 0x74f   : > { %1341 = vmatpush3.msra.mxu1 %v279_v10 }
 0x7bc   : > { %v960_v52 = vpop.permute.xlu1 %959 }
 0x7bd   : > { %v962_v53 = vadd.f32 %v960_v52, %v873_v43 }
 0x7bf   : > { %1387 = vtanh.f32 %v962_v53 }
 0x7c0   : > { %v971_v58 = vpop.permute.xlu1 %970 }
 0x7c1   : > { %v973_v61 = vmul.f32 %v1386_v50, %v971_v58 }
 0x7cc   : > { %v1388_v57 = vpop.eup %1387 }
 0x7cd   : > { %966 = vrot.lane.b32.xlu0 %v1388_v57, %s1475_s9 }
 0x83f   : > { %v967_v60 = vpop.permute.xlu0 %966 }
 0x840   : > { %v969_v62 = vmul.f32 %v967_v60, %v964_v59 }
 0x842   : > { %v974_v63 = vadd.f32 %v973_v61, %v969_v62 }
 0x844   : > { %978 = vrot.lane.b32.xlu0 %v974_v63, %s1475_s9 }
 0x8b6   : > { %v979_v0 = vpop.permute.xlu0 %978 }
 0x8b7   : > { %981 = vst.msk [vmem:[#allocation2 + $0x1] sm:$0x1] %vm371_vm3, %v979_v0  ;;  %1343 = vmatmul.mubr.msk.f32.vlgmr.msra.gmra.mxu1 %vm296_vm2, %v979_v0 }
 0x977   : > { %v1050_v1 = vpop.f32.mrf.mxu1 }
 0x978   : > { %v1051_v3 = vadd.f32 %v1050_v1, %v288_v2 }
 0x979   : > { %v1344_v4 = vpop.f32.mrf.mxu1 }
 0x97a   : > { %v1054_v6 = vsel %vm453_vm4, %v1051_v3, -inf }
 0x97b   : > { %1055 = vmax.xlane.f32.xlu1 %v1054_v6 }
 0xa04   : > { %v1056_v7 = vpop.xlane.xlu1 %1055 }
 0xa05   : > { %v1057_v8 = vsub.f32 %v1051_v3, %v1056_v7 }
 0xa07   : > { %v1058_v9 = vmul.f32 1.442695, %v1057_v8 }
 0xa09   : > { %1389 = vpow2.f32 %v1058_v9 }
 0xa16   : > { %v1390_v11 = vpop.eup %1389 }
 0xa17   : > { %v1060_v12 = vsel %vm453_vm4, %v1390_v11, 0.0 }
 0xa18   : > { %1061 = vadd.xlane.f32.xlu0 %v1060_v12 }
 0xaa1   : > { %v1062_v13 = vpop.xlane.xlu0 %1061 }
 0xaa2   : > { %1391 = vlog2.f32 %v1062_v13 }
 0xaaf   : > { %v1392_v14 = vpop.eup %1391 }
 0xab0   : > { %v1064_v15 = vmul.f32 0.6931472, %v1392_v14 }
 0xab2   : > { %v1065_v16 = vadd.f32 %v1064_v15, %v1056_v7  ;;  %1072 = sbr.rel (%p1155_p9) target bundleno = 2744 (0xab8), region = 48 }
 0xab4   : > { %v1066_v17 = vsub.f32 %v1051_v3, %v1065_v16 }
 0xab6   : > { %1164 = vst [vmem:[%s1162_s28 - $0x1] sm:$0x1] %v1066_v17 }
 0xab7   : > { %1073 = vst.msk [vmem:[#allocation7] sm:$0x1] %vm371_vm3, %v1782_v5  ;;  %1074 = vst.msk [vmem:[#allocation7 + $0x1] sm:$0x1] %vm371_vm3, %v979_v0 }
 0xab8 PF: > { %p1353_p10 = scmp.eq.s32.totalorder %s1533_s0, 2  ;;  %s1477_s29 = smov [#allocation5]  }
 0xab9   : > { %s1082_s30 = sshll.u32 %s1477_s29, 4  ;;  %s1478_s9 = smov [#allocation7]   ;;  %s1083_s30 = int_to_ptr.vmem [resolvable:$true] %s1082_s30 }
 0xaba   : > { %s1093_s11 = sshll.u32 %s1478_s9, 4  ;;  %s1405_s12 = scalar_lea.vmem %s1083_s30, 64  ;;  %s1094_s11 = int_to_ptr.vmem [resolvable:$true] %s1093_s11 }
 0xabb   : > { %p1406_p11 = scmp.ne.s32.totalorder %s1083_s30, %s1405_s12  ;;  %p1412_p0 = scmp.lt.s32.totalorder %s1083_s30, %s1083_s30 }
 0xabc   : > { %p1413_p1 = scmp.lt.s32.totalorder %s1405_s12, %s1405_s12 }
 0xabd   : > { %p1407_p12 = pnand %p1406_p11, %p1353_p10 }
 0xabe   : > { %p1414_p2 = por %p1413_p1, %p1412_p0 }
 0xabf   : > { %p1408_p13 = pneg %p1407_p12 }
 0xac1   : > { %p1415_p3 = pnand %p1414_p2, %p1408_p13 }
 0xac3   : > { %1418 = shalt.err (!%p1415_p3)
}
 0xac4   : > { %1346 = dma.vmem_to_hbm [thread:$0]  (%p1353_p10), %s1083_s30, 64, %s1857_s6, [#allocation6]  }
 0xac5   : > { %s1429_s16 = scalar_lea.vmem %s1094_s11, 32  ;;  %p1436_p7 = scmp.lt.s32.totalorder %s1094_s11, %s1094_s11 }
 0xac6   : > { %p1430_p4 = scmp.ne.s32.totalorder %s1094_s11, %s1429_s16  ;;  %p1437_p8 = scmp.lt.s32.totalorder %s1429_s16, %s1429_s16 }
 0xac8   : > { %p1431_p5 = pnand %p1430_p4, %p1353_p10  ;;  %p1438_p9 = por %p1437_p8, %p1436_p7 }
 0xaca   : > { %p1432_p6 = pneg %p1431_p5 }
 0xacc   : > { %p1439_p11 = pnand %p1438_p9, %p1432_p6 }
 0xace   : > { %1442 = shalt.err (!%p1439_p11)
}
 0xacf   : > { %1348 = dma.vmem_to_hbm [thread:$0]  (%p1353_p10), %s1094_s11, 32, %s1858_s7, [#allocation8]  }
 0xad0   : > { %1460 = dma.done.wait (%p1353_p10), [#allocation6], 64  }
 0xad1   : > { %1462 = vsyncadd (%p1353_p10), [#allocation6], 4294967232 }
 0xad2   : > { %1464 = dma.done.wait (%p1353_p10), [#allocation8], 32  }
 0xad3   : > { %1466 = vsyncadd (%p1353_p10), [#allocation8], 4294967264 }
 0xad4 PF: > { %s27_s10 = sadd.s32 1, %s1469_s10  }
 0xad5   : > { %p24_p12 = scmp.ge.s32.totalorder %s27_s10, 5  }
 0xad7   :  { %26 = sbr.rel (!%p24_p12) target bundleno = 17 (0x11), region = 91 }
 0xadc   :  { %1116 = vsyncpa [#allocation6], 1 }
 0xadd   :  { %1118 = vsyncpa [#allocation6 + $0x1], 1 }
 0xade   :  { %1119 = vsyncpa [#allocation8], 1 }

</bundles_post_ra>
